<compile_context>
chip_gen: v7x
topology: tpu7x:2x2x1
jax: 0.10.0
libtpu: 0.0.40
codegen_flags: <defaults>
</compile_context>

<pallas_src>
import functools
import numpy as np

import jax
import jax.numpy as jnp
from jax.experimental import pallas as pl
from jax.experimental.pallas import tpu as pltpu

# Tap tables for the stride-2 / k=5 transposed conv after the [1:-2] crop.
# Cropped output index y = 2*u + p maps to full output Y = y + 1 = 2*i + k,
# i.e. i = u + d with:
#   p == 0 -> (k, d) in {(1, 0), (3, -1)}
#   p == 1 -> (k, d) in {(0, +1), (2, 0), (4, -1)}
_TAPS = {0: ((1, 0), (3, -1)), 1: ((0, 1), (2, 0), (4, -1))}
_K_OF_D = [{d: k for (k, d) in _TAPS[p]} for p in (0, 1)]      # parity -> {d: k}
_SHIFTS = tuple((di, dj) for di in (-1, 0, 1) for dj in (-1, 0, 1))


def _round_up(x, m):
    return (x + m - 1) // m * m


def _conv_relu_stats_kernel(xa_ref, xb_ref, w_ref, b_ref, mask_ref,
                            pre_ref, stats_ref, *, offsets):
    """One M-tile: all transposed-conv taps + bias + ReLU as a single MXU dot,
    lane-dense pre-BN output tile and masked per-tile BN partial sums."""
    rows, tm = pre_ref.shape                      # rows == 4 * Cout
    cout = rows // 4
    halo = max(offsets)

    # [tile | halo] window of the flattened padded input: (Cin_pad, TM + halo).
    window = jnp.concatenate([xa_ref[...], xb_ref[:, :halo]], axis=1)
    # Stack the 9 spatial taps along the contraction axis -> (9*Cin_pad, TM).
    rhs = jnp.concatenate([window[:, o:o + tm] for o in offsets], axis=0)

    # One matmul for all 4 output phases: (4*Cout, K) @ (K, TM), f32 accumulate.
    acc = jnp.dot(w_ref[...], rhs, preferred_element_type=jnp.float32)
    acc = jnp.maximum(acc + b_ref[...], 0.0)                 # bias + ReLU

    pre_ref[...] = acc                                        # lane-dense store

    # Masked BN partial sums over valid (interior) positions of this tile.
    am = acc * mask_ref[...]
    s1 = jnp.sum(jnp.sum(am.reshape(4, cout, tm), axis=0), axis=1, keepdims=True)
    s2 = jnp.sum(jnp.sum((am * acc).reshape(4, cout, tm), axis=0), axis=1,
                 keepdims=True)
    stats_ref[0] = jnp.concatenate([s1, s2], axis=1)          # (Cout, 2)


def _bn_apply_kernel(pre_ref, scale_ref, shift_ref, out_ref):
    """In-place (aliased) affine: y = pre * scale + shift."""
    out_ref[...] = pre_ref[...] * scale_ref[...] + shift_ref[...]


@functools.partial(jax.jit, static_argnames=("eps", "tm"))
def decoder_block(x_nchw, w, b, gamma, beta, *, eps=1e-3, tm=256):
    """x_nchw: (N, Cin, H, W); w: (Cin, Cout, 5, 5) (PyTorch ConvTranspose2d)."""
    N, Cin, H, W = x_nchw.shape
    Cout = w.shape[1]
    Hp, Wp = H + 2, W + 2
    Mp = N * Hp * Wp                       # flattened padded spatial extent
    shift_pad = Wp + 1                     # max |flat shift| of a tap
    cin_p = _round_up(Cin, 8)              # sublane-aligned channel count

    tm = max(tm, _round_up(2 * shift_pad, 128))
    assert tm % 128 == 0
    n_tiles = pl.cdiv(Mp, tm)
    mp_pad = n_tiles * tm
    m_ext = mp_pad + tm                    # one extra input block => halo never clamps

    # ---- input: NCHW -> (Cin_pad, N*Hp*Wp) with zero halo padding, passed once.
    xc = jnp.transpose(x_nchw, (1, 0, 2, 3)).astype(jnp.float32)
    xp = jnp.pad(xc, ((0, cin_p - Cin), (0, 0), (1, 1), (1, 1)))
    x_ext = jnp.pad(xp.reshape(cin_p, Mp),
                    ((0, 0), (shift_pad, m_ext - shift_pad - Mp)))

    # ---- weights: one (4*Cout, 9*Cin_pad) matrix; phase-major rows,
    #      (di,dj)-major column blocks, unused taps are zero blocks.
    wt = jnp.transpose(w, (2, 3, 1, 0)).astype(jnp.float32)       # (5,5,Cout,Cin)
    wt = jnp.pad(wt, ((0, 0), (0, 0), (0, 0), (0, cin_p - Cin)))
    zero_blk = jnp.zeros((Cout, cin_p), jnp.float32)
    rows = []
    for py in (0, 1):
        for px in (0, 1):
            blocks = []
            for di, dj in _SHIFTS:
                kh = _K_OF_D[py].get(di)
                kw = _K_OF_D[px].get(dj)
                blocks.append(wt[kh, kw] if (kh is not None and kw is not None)
                              else zero_blk)
            rows.append(jnp.concatenate(blocks, axis=1))
    w_all = jnp.concatenate(rows, axis=0)                         # (4*Cout, 9*cin_p)
    b4 = jnp.tile(b.astype(jnp.float32), 4)[:, None]              # (4*Cout, 1)

    # ---- static validity mask (interior pixels of the padded flat axis).
    m_idx = np.arange(Mp)
    hrow, wcol = (m_idx // Wp) % Hp, m_idx % Wp
    valid = ((hrow >= 1) & (hrow <= H) & (wcol >= 1) & (wcol <= W)).astype(np.float32)
    mask_np = np.zeros((1, mp_pad), np.float32)
    mask_np[0, :Mp] = valid
    mask = jnp.asarray(mask_np)

    # Static lane offsets of the 9 taps inside the [tile | halo] window.
    offsets = tuple(shift_pad + di * Wp + dj for di, dj in _SHIFTS)

    # ---- pass 1: conv taps + bias + ReLU, pre-BN output + per-tile stats.
    kernel1 = functools.partial(_conv_relu_stats_kernel, offsets=offsets)
    pre, stats = pl.pallas_call(
        kernel1,
        grid=(n_tiles,),
        in_specs=[
            pl.BlockSpec((cin_p, tm), lambda t: (0, t)),          # tile
            pl.BlockSpec((cin_p, tm), lambda t: (0, t + 1)),      # halo (next block)
            pl.BlockSpec((4 * Cout, 9 * cin_p), lambda t: (0, 0)),
            pl.BlockSpec((4 * Cout, 1), lambda t: (0, 0)),
            pl.BlockSpec((1, tm), lambda t: (0, t)),
        ],
        out_specs=(
            pl.BlockSpec((4 * Cout, tm), lambda t: (0, t)),
            pl.BlockSpec((1, Cout, 2), lambda t: (t, 0, 0)),
        ),
        out_shape=(
            jax.ShapeDtypeStruct((4 * Cout, mp_pad), jnp.float32),
            jax.ShapeDtypeStruct((n_tiles, Cout, 2), jnp.float32),
        ),
        compiler_params=pltpu.CompilerParams(dimension_semantics=("parallel",)),
    )(x_ext, x_ext, w_all, b4, mask)

    # ---- global BN statistics (tiny, plain JAX) -> per-channel scale / shift.
    s = jnp.sum(stats, axis=0)                                    # (Cout, 2)
    count = jnp.float32(4 * N * H * W)
    mean = s[:, 0] / count
    var = jnp.maximum(s[:, 1] / count - mean * mean, 0.0)         # biased variance
    scale = gamma.astype(jnp.float32) / jnp.sqrt(var + eps)
    shift = beta.astype(jnp.float32) - mean * scale
    scale4 = jnp.tile(scale, 4)[:, None]                          # (4*Cout, 1)
    shift4 = jnp.tile(shift, 4)[:, None]

    # ---- pass 2 tile: memory-bound elementwise -> largest lane tile that
    #      divides the slab and keeps one block under ~2 MiB.
    unit_bytes = 4 * Cout * tm * 4
    d = 1
    for cand in range(n_tiles, 0, -1):
        if n_tiles % cand == 0 and unit_bytes * cand <= (2 << 20):
            d = cand
            break
    tm2, n2 = tm * d, n_tiles // d

    # ---- pass 2: in-place normalization (output aliases the pre-BN buffer).
    y = pl.pallas_call(
        _bn_apply_kernel,
        grid=(n2,),
        in_specs=[
            pl.BlockSpec((4 * Cout, tm2), lambda t: (0, t)),
            pl.BlockSpec((4 * Cout, 1), lambda t: (0, 0)),
            pl.BlockSpec((4 * Cout, 1), lambda t: (0, 0)),
        ],
        out_specs=pl.BlockSpec((4 * Cout, tm2), lambda t: (0, t)),
        out_shape=jax.ShapeDtypeStruct((4 * Cout, mp_pad), jnp.float32),
        input_output_aliases={0: 0},
        compiler_params=pltpu.CompilerParams(dimension_semantics=("parallel",)),
    )(pre, scale4, shift4)

    # ---- glue: drop pads / crop borders / interleave the 2x2 phases -> NCHW.
    y = y[:, :Mp].reshape(2, 2, Cout, N, Hp, Wp)[:, :, :, :, 1:H + 1, 1:W + 1]
    y = jnp.transpose(y, (3, 2, 4, 0, 5, 1)).reshape(N, Cout, 2 * H, 2 * W)
    return y


def ref_decoder_block(x, w, b, gamma, beta, eps=1e-3):
    """Plain-JAX reference mirroring the PyTorch forward (training-mode BN)."""
    N, Cin, H, W = x.shape
    Cout = w.shape[1]
    S_h, S_w = 2 * H + 3, 2 * W + 3
    out = jnp.zeros((N, Cout, S_h, S_w), jnp.float32)
    for kh in range(5):
        for kw in range(5):
            contrib = jnp.einsum('nchw,cd->ndhw', x, w[:, :, kh, kw])
            out = out.at[:, :, kh:kh + 2 * H:2, kw:kw + 2 * W:2].add(contrib)
    out = out + b[None, :, None, None]
    up = out[:, :, 1:-2, 1:-2]
    up = jnp.maximum(up, 0.0)
    mean = up.mean(axis=(0, 2, 3), keepdims=True)
    var = up.var(axis=(0, 2, 3), keepdims=True)   # biased
    return ((up - mean) / jnp.sqrt(var + eps) * gamma[None, :, None, None]
            + beta[None, :, None, None])


if __name__ == "__main__":
    N, Cin, Cout, H, W = 2, 4, 8, 16, 16
    key = jax.random.PRNGKey(0)
    kx, kw, kb, kg, kbe = jax.random.split(key, 5)
    x = jax.random.normal(kx, (N, Cin, H, W), jnp.float32)
    w = 0.1 * jax.random.normal(kw, (Cin, Cout, 5, 5), jnp.float32)
    b = 0.1 * jax.random.normal(kb, (Cout,), jnp.float32)
    gamma = 1.0 + 0.1 * jax.random.normal(kg, (Cout,), jnp.float32)
    beta = 0.1 * jax.random.normal(kbe, (Cout,), jnp.float32)

    out = jax.block_until_ready(decoder_block(x, w, b, gamma, beta))
    ref = jax.block_until_ready(ref_decoder_block(x, w, b, gamma, beta))

    assert out.shape == (N, Cout, 2 * H, 2 * W), out.shape
    np.testing.assert_allclose(np.asarray(out), np.asarray(ref),
                               rtol=2e-3, atol=2e-3)
    print("KERNEL_OK")
</pallas_src>

<mosaic_0001>
module attributes {stable_mosaic.version = 11 : i64} {
  func.func @_conv_relu_stats_kernel(%arg0: i32, %arg1: memref<8x256xf32, #tpu.memory_space<vmem>>, %arg2: memref<8x256xf32, #tpu.memory_space<vmem>>, %arg3: memref<32x72xf32, #tpu.memory_space<vmem>>, %arg4: memref<32x1xf32, #tpu.memory_space<vmem>>, %arg5: memref<1x256xf32, #tpu.memory_space<vmem>>, %arg6: memref<32x256xf32, #tpu.memory_space<vmem>>, %arg7: memref<1x8x2xf32, #tpu.memory_space<vmem>>) attributes {dimension_semantics = [#tpu.dimension_semantics<parallel>], iteration_bounds = array<i64: 3>, scalar_prefetch = 0 : i64, scratch_operands = 0 : i64, tpu.core_type = #tpu.core_type<tc>, window_params = [{transform_indices = @transform_0, window_bounds = array<i64: 8, 256>}, {transform_indices = @transform_1, window_bounds = array<i64: 8, 256>}, {pipeline_mode = #tpu.pipeline_mode<synchronous>, transform_indices = @transform_2, window_bounds = array<i64: 32, 72>}, {pipeline_mode = #tpu.pipeline_mode<synchronous>, transform_indices = @transform_3, window_bounds = array<i64: 32, 1>}, {transform_indices = @transform_4, window_bounds = array<i64: 1, 256>}, {transform_indices = @transform_5, window_bounds = array<i64: 32, 256>}, {transform_indices = @transform_6, window_bounds = array<i64: 1, 8, 2>}]} {
    %c0 = arith.constant 0 : index
    %c0_0 = arith.constant 0 : index
    %0 = vector.load %arg1[%c0, %c0_0] : memref<8x256xf32, #tpu.memory_space<vmem>>, vector<8x256xf32>
    %c0_1 = arith.constant 0 : index
    %c0_2 = arith.constant 0 : index
    %1 = vector.load %arg2[%c0_1, %c0_2] : memref<8x256xf32, #tpu.memory_space<vmem>>, vector<8x38xf32>
    %2 = tpu.concatenate %0, %1 in 1 : vector<8x256xf32>, vector<8x38xf32> -> vector<8x294xf32>
    %3 = vector.extract_strided_slice %2 {offsets = [0, 0], sizes = [8, 256], strides = [1, 1]} : vector<8x294xf32> to vector<8x256xf32>
    %4 = vector.extract_strided_slice %2 {offsets = [0, 1], sizes = [8, 256], strides = [1, 1]} : vector<8x294xf32> to vector<8x256xf32>
    %5 = vector.extract_strided_slice %2 {offsets = [0, 2], sizes = [8, 256], strides = [1, 1]} : vector<8x294xf32> to vector<8x256xf32>
    %6 = vector.extract_strided_slice %2 {offsets = [0, 18], sizes = [8, 256], strides = [1, 1]} : vector<8x294xf32> to vector<8x256xf32>
    %7 = vector.extract_strided_slice %2 {offsets = [0, 19], sizes = [8, 256], strides = [1, 1]} : vector<8x294xf32> to vector<8x256xf32>
    %8 = vector.extract_strided_slice %2 {offsets = [0, 20], sizes = [8, 256], strides = [1, 1]} : vector<8x294xf32> to vector<8x256xf32>
    %9 = vector.extract_strided_slice %2 {offsets = [0, 36], sizes = [8, 256], strides = [1, 1]} : vector<8x294xf32> to vector<8x256xf32>
    %10 = vector.extract_strided_slice %2 {offsets = [0, 37], sizes = [8, 256], strides = [1, 1]} : vector<8x294xf32> to vector<8x256xf32>
    %11 = vector.extract_strided_slice %2 {offsets = [0, 38], sizes = [8, 256], strides = [1, 1]} : vector<8x294xf32> to vector<8x256xf32>
    %12 = tpu.concatenate %3, %4, %5, %6, %7, %8, %9, %10, %11 in 0 : vector<8x256xf32>, vector<8x256xf32>, vector<8x256xf32>, vector<8x256xf32>, vector<8x256xf32>, vector<8x256xf32>, vector<8x256xf32>, vector<8x256xf32>, vector<8x256xf32> -> vector<72x256xf32>
    %c0_3 = arith.constant 0 : index
    %c0_4 = arith.constant 0 : index
    %13 = vector.load %arg3[%c0_3, %c0_4] : memref<32x72xf32, #tpu.memory_space<vmem>>, vector<32x72xf32>
    %cst = arith.constant dense<0.000000e+00> : vector<32x256xf32>
    %14 = tpu.matmul %13, %12, %cst {dimension_numbers = #tpu.dot_dimension_numbers<[1], [0], [0], [1], [0, 0, 1, 1], [], []>} : vector<32x72xf32>, vector<72x256xf32>, vector<32x256xf32> -> vector<32x256xf32>
    %c0_5 = arith.constant 0 : index
    %c0_6 = arith.constant 0 : index
    %15 = vector.load %arg4[%c0_5, %c0_6] : memref<32x1xf32, #tpu.memory_space<vmem>>, vector<32x1xf32>
    %16 = vector.broadcast %15 : vector<32x1xf32> to vector<32x256xf32>
    %17 = arith.addf %14, %16 : vector<32x256xf32>
    %cst_7 = arith.constant 0.000000e+00 : f32
    %18 = vector.broadcast %cst_7 : f32 to vector<32x256xf32>
    %19 = arith.maximumf %17, %18 : vector<32x256xf32>
    %c0_8 = arith.constant 0 : index
    %c0_9 = arith.constant 0 : index
    %20 = vector.load %arg6[%c0_8, %c0_9] : memref<32x256xf32, #tpu.memory_space<vmem>>, vector<32x256xf32>
    tpu.vector_store %arg6[%c0_8, %c0_9], %19 {strides = array<i32>} : memref<32x256xf32, #tpu.memory_space<vmem>>, vector<32x256xf32>,
    %c0_10 = arith.constant 0 : index
    %c0_11 = arith.constant 0 : index
    %21 = vector.load %arg5[%c0_10, %c0_11] : memref<1x256xf32, #tpu.memory_space<vmem>>, vector<1x256xf32>
    %22 = vector.broadcast %21 : vector<1x256xf32> to vector<32x256xf32>
    %23 = arith.mulf %19, %22 : vector<32x256xf32>
    %24 = vector.shape_cast %23 : vector<32x256xf32> to vector<4x8x256xf32>
    %cst_12 = arith.constant dense<0.000000e+00> : vector<8x256xf32>
    %25 = vector.multi_reduction <add>, %24, %cst_12 [0] : vector<4x8x256xf32> to vector<8x256xf32>
    %cst_13 = arith.constant dense<0.000000e+00> : vector<8xf32>
    %26 = vector.multi_reduction <add>, %25, %cst_13 [1] : vector<8x256xf32> to vector<8xf32>
    %27 = vector.shape_cast %26 : vector<8xf32> to vector<8x1xf32>
    %28 = arith.mulf %23, %19 : vector<32x256xf32>
    %29 = vector.shape_cast %28 : vector<32x256xf32> to vector<4x8x256xf32>
    %cst_14 = arith.constant dense<0.000000e+00> : vector<8x256xf32>
    %30 = vector.multi_reduction <add>, %29, %cst_14 [0] : vector<4x8x256xf32> to vector<8x256xf32>
    %cst_15 = arith.constant dense<0.000000e+00> : vector<8xf32>
    %31 = vector.multi_reduction <add>, %30, %cst_15 [1] : vector<8x256xf32> to vector<8xf32>
    %32 = vector.shape_cast %31 : vector<8xf32> to vector<8x1xf32>
    %33 = tpu.concatenate %27, %32 in 1 : vector<8x1xf32>, vector<8x1xf32> -> vector<8x2xf32>
    %c0_16 = arith.constant 0 : index
    %c0_17 = arith.constant 0 : index
    %c0_18 = arith.constant 0 : index
    %34 = vector.load %arg7[%c0_16, %c0_17, %c0_18] : memref<1x8x2xf32, #tpu.memory_space<vmem>>, vector<1x8x2xf32>
    %35 = vector.shape_cast %34 : vector<1x8x2xf32> to vector<8x2xf32>
    %36 = vector.shape_cast %33 : vector<8x2xf32> to vector<1x8x2xf32>
    tpu.vector_store %arg7[%c0_16, %c0_17, %c0_18], %36 {strides = array<i32>} : memref<1x8x2xf32, #tpu.memory_space<vmem>>, vector<1x8x2xf32>,
    return
  }
  func.func @transform_0(%arg0: i32) -> (i32, i32) {
    %c0_i32 = arith.constant 0 : i32
    %c0_i32_0 = arith.constant 0 : i32
    return %c0_i32, %arg0 : i32, i32
  }
  func.func @transform_1(%arg0: i32) -> (i32, i32) {
    %c1_i32 = arith.constant 1 : i32
    %0 = arith.addi %arg0, %c1_i32 : i32
    %c0_i32 = arith.constant 0 : i32
    %c0_i32_0 = arith.constant 0 : i32
    return %c0_i32, %0 : i32, i32
  }
  func.func @transform_2(%arg0: i32) -> (i32, i32) {
    %c0_i32 = arith.constant 0 : i32
    %c0_i32_0 = arith.constant 0 : i32
    %c0_i32_1 = arith.constant 0 : i32
    return %c0_i32, %c0_i32_0 : i32, i32
  }
  func.func @transform_3(%arg0: i32) -> (i32, i32) {
    %c0_i32 = arith.constant 0 : i32
    %c0_i32_0 = arith.constant 0 : i32
    %c0_i32_1 = arith.constant 0 : i32
    return %c0_i32, %c0_i32_0 : i32, i32
  }
  func.func @transform_4(%arg0: i32) -> (i32, i32) {
    %c0_i32 = arith.constant 0 : i32
    %c0_i32_0 = arith.constant 0 : i32
    return %c0_i32, %arg0 : i32, i32
  }
  func.func @transform_5(%arg0: i32) -> (i32, i32) {
    %c0_i32 = arith.constant 0 : i32
    %c0_i32_0 = arith.constant 0 : i32
    return %c0_i32, %arg0 : i32, i32
  }
  func.func @transform_6(%arg0: i32) -> (i32, i32, i32) {
    %c0_i32 = arith.constant 0 : i32
    %c0_i32_0 = arith.constant 0 : i32
    %c0_i32_1 = arith.constant 0 : i32
    return %arg0, %c0_i32, %c0_i32_0 : i32, i32, i32
  }
}

module attributes {stable_mosaic.version = 11 : i64} {
  func.func @_bn_apply_kernel(%arg0: i32, %arg1: memref<32x768xf32, #tpu.memory_space<vmem>>, %arg2: memref<32x1xf32, #tpu.memory_space<vmem>>, %arg3: memref<32x1xf32, #tpu.memory_space<vmem>>, %arg4: memref<32x768xf32, #tpu.memory_space<vmem>>) attributes {dimension_semantics = [#tpu.dimension_semantics<parallel>], iteration_bounds = array<i64: 1>, scalar_prefetch = 0 : i64, scratch_operands = 0 : i64, tpu.core_type = #tpu.core_type<tc>, window_params = [{transform_indices = @transform_0, window_bounds = array<i64: 32, 768>}, {pipeline_mode = #tpu.pipeline_mode<synchronous>, transform_indices = @transform_1, window_bounds = array<i64: 32, 1>}, {pipeline_mode = #tpu.pipeline_mode<synchronous>, transform_indices = @transform_2, window_bounds = array<i64: 32, 1>}, {transform_indices = @transform_3, window_bounds = array<i64: 32, 768>}]} {
    %c0 = arith.constant 0 : index
    %c0_0 = arith.constant 0 : index
    %0 = vector.load %arg1[%c0, %c0_0] : memref<32x768xf32, #tpu.memory_space<vmem>>, vector<32x768xf32>
    %c0_1 = arith.constant 0 : index
    %c0_2 = arith.constant 0 : index
    %1 = vector.load %arg2[%c0_1, %c0_2] : memref<32x1xf32, #tpu.memory_space<vmem>>, vector<32x1xf32>
    %2 = vector.broadcast %1 : vector<32x1xf32> to vector<32x768xf32>
    %3 = arith.mulf %0, %2 : vector<32x768xf32>
    %c0_3 = arith.constant 0 : index
    %c0_4 = arith.constant 0 : index
    %4 = vector.load %arg3[%c0_3, %c0_4] : memref<32x1xf32, #tpu.memory_space<vmem>>, vector<32x1xf32>
    %5 = vector.broadcast %4 : vector<32x1xf32> to vector<32x768xf32>
    %6 = arith.addf %3, %5 : vector<32x768xf32>
    %c0_5 = arith.constant 0 : index
    %c0_6 = arith.constant 0 : index
    %7 = vector.load %arg4[%c0_5, %c0_6] : memref<32x768xf32, #tpu.memory_space<vmem>>, vector<32x768xf32>
    tpu.vector_store %arg4[%c0_5, %c0_6], %6 {strides = array<i32>} : memref<32x768xf32, #tpu.memory_space<vmem>>, vector<32x768xf32>,
    return
  }
  func.func @transform_0(%arg0: i32) -> (i32, i32) {
    %c0_i32 = arith.constant 0 : i32
    %c0_i32_0 = arith.constant 0 : i32
    return %c0_i32, %arg0 : i32, i32
  }
  func.func @transform_1(%arg0: i32) -> (i32, i32) {
    %c0_i32 = arith.constant 0 : i32
    %c0_i32_0 = arith.constant 0 : i32
    %c0_i32_1 = arith.constant 0 : i32
    return %c0_i32, %c0_i32_0 : i32, i32
  }
  func.func @transform_2(%arg0: i32) -> (i32, i32) {
    %c0_i32 = arith.constant 0 : i32
    %c0_i32_0 = arith.constant 0 : i32
    %c0_i32_1 = arith.constant 0 : i32
    return %c0_i32, %c0_i32_0 : i32, i32
  }
  func.func @transform_3(%arg0: i32) -> (i32, i32) {
    %c0_i32 = arith.constant 0 : i32
    %c0_i32_0 = arith.constant 0 : i32
    return %c0_i32, %arg0 : i32, i32
  }
}

</mosaic_0001>

<bundles_post_ra>
// kernel: tile.18
= control target key start
LH: loop header
LB: loop body
LE: loop exit
PB: predicated region body
PF: predicated region fallthrough
CT: control target
= control target key end

     0   :  { %s22_s0 = inlined_call_operand.vmem [shape: f32[8], index: 0, kind: input, shape index: {}]   ;;  %s23_s1 = inlined_call_operand.vmem [shape: f32[4,8], index: 1, kind: output, shape index: {}]  }
   0x1   :  { %v4_v0 = vld [vmem:[%s22_s0] ss:$0 sm:$0xff] }
   0x2   :  { %5 = vst [vmem:[%s23_s1] sm:$0xf] %v4_v0 }

// kernel: tile.0
= control target key start
LH: loop header
LB: loop body
LE: loop exit
PB: predicated region body
PF: predicated region fallthrough
CT: control target
= control target key end

     0   :  { %s66_s8 = smov 125   ;;  %vm7_vm0 = vcmask 7168   ;;  %s67_s11 = smov 126   ;;  %s117_s0 = inlined_call_operand.vmem [shape: f32[4,8], index: 0, kind: input, shape index: {}]   ;;  %s118_s1 = inlined_call_operand.vmem [shape: f32[32,1], index: 1, kind: output, shape index: {}]  }
   0x1   :  { %v4_v0 = vld [vmem:[%s117_s0] sm:$0xf]  ;;  %s65_s0 = smov 127   ;;  %s68_s12 = smov 124  }
   0x2   :  { %5 = vst [vmem:[#allocation0] sm:$0xf] %v4_v0  ;;  %s69_s13 = smov 123   ;;  %s70_s14 = smov 122  }
   0x3   :  { %s71_s15 = smov 121  }
   0x9   :  { %v9_v1 = vld [vmem:[#allocation0] sm:$0xf]  }
   0xa   :  { %v21_v2 = vld [vmem:[#allocation0] sm:$0xf]   ;;  %10 = vrot.lane.b32.xlu0 %v9_v1, %s65_s0 }
   0xb   :  { %22 = vrot.lane.b32.xlu1 %v21_v2, %s66_s8  ;;  %v15_v3 = vld [vmem:[#allocation0] sm:$0xf]  }
   0xc   :  { %v27_v4 = vld [vmem:[#allocation0] sm:$0xf]  }
   0xd   :  { %v6_v5 = vld [vmem:[#allocation0] sm:$0xf]  }
   0xe   :  { %8 = vst.msk [vmem:[%s118_s1] ss:$8 sm:$0xf] %vm7_vm0, %v6_v5   ;;  %16 = vrot.lane.b32.xlu0 %v15_v3, %s67_s11  ;;  %v33_v6 = vld [vmem:[#allocation0] sm:$0xf]  }
   0xf   :  { %28 = vrot.lane.b32.xlu1 %v27_v4, %s68_s12  ;;  %v39_v7 = vld [vmem:[#allocation0] sm:$0xf]  }
  0x10   :  { %v45_v8 = vld [vmem:[#allocation0] sm:$0xf]  }
  0x12   :  { %34 = vrot.lane.b32.xlu0 %v33_v6, %s69_s13 }
  0x13   :  { %40 = vrot.lane.b32.xlu1 %v39_v7, %s70_s14 }
  0x16   :  { %46 = vrot.lane.b32.xlu0 %v45_v8, %s71_s15 }
  0x7c   :  { %v11_v9 = vpop.permute.xlu0 %10  }
  0x7d   :  { %v23_v10 = vpop.permute.xlu1 %22   ;;  %51 = vst.msk [vmem:[%s118_s1 + $0x1] ss:$8 sm:$0xf] %vm7_vm0, %v11_v9  }
  0x7e   :  { %53 = vst.msk [vmem:[%s118_s1 + $0x3] ss:$8 sm:$0xf] %vm7_vm0, %v23_v10  }
  0x80   :  { %v17_v11 = vpop.permute.xlu0 %16  }
  0x81   :  { %v29_v12 = vpop.permute.xlu1 %28   ;;  %52 = vst.msk [vmem:[%s118_s1 + $0x2] ss:$8 sm:$0xf] %vm7_vm0, %v17_v11  }
  0x82   :  { %54 = vst.msk [vmem:[%s118_s1 + $0x4] ss:$8 sm:$0xf] %vm7_vm0, %v29_v12  }
  0x84   :  { %v35_v13 = vpop.permute.xlu0 %34  }
  0x85   :  { %v41_v14 = vpop.permute.xlu1 %40   ;;  %55 = vst.msk [vmem:[%s118_s1 + $0x5] ss:$8 sm:$0xf] %vm7_vm0, %v35_v13  }
  0x86   :  { %56 = vst.msk [vmem:[%s118_s1 + $0x6] ss:$8 sm:$0xf] %vm7_vm0, %v41_v14  }
  0x88   :  { %v47_v15 = vpop.permute.xlu0 %46  }
  0x89   :  { %57 = vst.msk [vmem:[%s118_s1 + $0x7] ss:$8 sm:$0xf] %vm7_vm0, %v47_v15  }

// kernel: decoder_block.3
= control target key start
LH: loop header
LB: loop body
LE: loop exit
PB: predicated region body
PF: predicated region fallthrough
CT: control target
= control target key end

     0   :  { %v165_v0 = vmov 0   ;;  %s362_s1 = inlined_call_operand.vmem [shape: f32[32,1], index: 1, kind: input, shape index: {}]   ;;  %s363_s2 = inlined_call_operand.vmem [shape: f32[32,1], index: 2, kind: input, shape index: {}]   ;;  %s364_s0 = inlined_call_operand.vmem [shape: f32[32,768], index: 0, kind: input, shape index: {}, may-alias: {0,3}]   ;;  %s365_s3 = inlined_call_operand.vmem [shape: f32[32,768], index: 3, kind: output, shape index: {}, may-alias: {0,3}]  }
   0x1   :  { %164 = vset.pattern.permute.xlu1 %v165_v0  ;;  %163 = vset.pattern.permute.xlu0 %v165_v0  ;;  %v40_v1 = vld [vmem:[%s362_s1 + $0x10] sm:$0xff]  ;;  %v38_v2 = vld [vmem:[%s362_s1] sm:$0xff]  ;;  %v41_v3 = vld [vmem:[%s362_s1 + $0x18] sm:$0xff] }
   0x2   :  { %54 = vperm.xlu1 %164, %v40_v1   ;;  %44 = vperm.xlu0 %163, %v38_v2   ;;  %v39_v4 = vld [vmem:[%s362_s1 + $0x8] sm:$0xff]  ;;  %v86_v6 = vld [vmem:[%s363_s2] sm:$0xff]  ;;  %v89_v7 = vld [vmem:[%s363_s2 + $0x18] sm:$0xff] }
   0x3   :  { %v87_v5 = vld [vmem:[%s363_s2 + $0x8] sm:$0xff]  ;;  %v88_v8 = vld [vmem:[%s363_s2 + $0x10] sm:$0xff]  ;;  %v14_v9 = vld [vmem:[%s364_s0] sm:$0xff] }
   0x4   :  { %v15_v10 = vld [vmem:[%s364_s0 + $0x8] sm:$0xff]  ;;  %v16_v13 = vld [vmem:[%s364_s0 + $0x10] sm:$0xff]  ;;  %v17_v14 = vld [vmem:[%s364_s0 + $0x18] sm:$0xff] }
   0x5   :  { %v18_v15 = vld [vmem:[%s364_s0 + $0x20] sm:$0xff]  ;;  %v19_v16 = vld [vmem:[%s364_s0 + $0x28] sm:$0xff]  ;;  %v20_v17 = vld [vmem:[%s364_s0 + $0x30] sm:$0xff] }
   0x6   :  { %59 = vperm.xlu1 %164, %v41_v3   ;;  %49 = vperm.xlu0 %163, %v39_v4   ;;  %v21_v18 = vld [vmem:[%s364_s0 + $0x38] sm:$0xff]  ;;  %v22_v19 = vld [vmem:[%s364_s0 + $0x40] sm:$0xff]  ;;  %v27_v21 = vld [vmem:[%s364_s0 + $0x68] sm:$0xff] }
   0x7   :  { %v26_v20 = vld [vmem:[%s364_s0 + $0x60] sm:$0xff]  ;;  %v23_v22 = vld [vmem:[%s364_s0 + $0x48] sm:$0xff]  ;;  %v28_v23 = vld [vmem:[%s364_s0 + $0x70] sm:$0xff] }
   0x8   :  { %v29_v24 = vld [vmem:[%s364_s0 + $0x78] sm:$0xff]  ;;  %v24_v31 = vld [vmem:[%s364_s0 + $0x50] sm:$0xff]  ;;  %v34_v37 = vld [vmem:[%s364_s0 + $0xa0] sm:$0xff] }
   0x9   :  { %v25_v32 = vld [vmem:[%s364_s0 + $0x58] sm:$0xff]  ;;  %v32_v33 = vld [vmem:[%s364_s0 + $0x90] sm:$0xff]  ;;  %v35_v38 = vld [vmem:[%s364_s0 + $0xa8] sm:$0xff] }
   0xa   :  { %97 = vperm.xlu1 %164, %v87_v5   ;;  %92 = vperm.xlu0 %163, %v86_v6   ;;  %v33_v36 = vld [vmem:[%s364_s0 + $0x98] sm:$0xff]  ;;  %v36_v51 = vld [vmem:[%s364_s0 + $0xb0] sm:$0xff]  ;;  %v30_v61 = vld [vmem:[%s364_s0 + $0x80] sm:$0xff] }
   0xb   :  { %v37_v60 = vld [vmem:[%s364_s0 + $0xb8] sm:$0xff]  ;;  %v31_v62 = vld [vmem:[%s364_s0 + $0x88] sm:$0xff] }
   0xe   :  { %107 = vperm.xlu1 %164, %v89_v7   ;;  %102 = vperm.xlu0 %163, %v88_v8  }
  0x81   :  { %v216_v11 = vpop.permute.xlu1 %54  ;;  %v45_v12 = vpop.permute.xlu0 %44 }
  0x82   :  { %v62_v25 = vmul.f32 %v45_v12, %v14_v9  ;;  %v63_v26 = vmul.f32 %v45_v12, %v15_v10  ;;  %v64_v27 = vmul.f32 %v45_v12, %v16_v13  ;;  %v65_v28 = vmul.f32 %v45_v12, %v17_v14 }
  0x83   :  { %v66_v34 = vmul.f32 %v45_v12, %v18_v15  ;;  %v67_v35 = vmul.f32 %v45_v12, %v19_v16  ;;  %v74_v39 = vmul.f32 %v216_v11, %v26_v20  ;;  %v75_v40 = vmul.f32 %v216_v11, %v27_v21 }
  0x84   :  { %v76_v43 = vmul.f32 %v216_v11, %v28_v23  ;;  %v77_v44 = vmul.f32 %v216_v11, %v29_v24  ;;  %v78_v12 = vmul.f32 %v216_v11, %v30_v61  ;;  %v79_v13 = vmul.f32 %v216_v11, %v31_v62 }
  0x85   :  { %v60_v29 = vpop.permute.xlu1 %59  ;;  %v50_v30 = vpop.permute.xlu0 %49 }
  0x86   :  { %v68_v41 = vmul.f32 %v50_v30, %v20_v17  ;;  %v69_v42 = vmul.f32 %v50_v30, %v21_v18  ;;  %v70_v45 = vmul.f32 %v50_v30, %v22_v19  ;;  %v71_v46 = vmul.f32 %v50_v30, %v23_v22 }
  0x87   :  { %v72_v47 = vmul.f32 %v50_v30, %v24_v31  ;;  %v73_v48 = vmul.f32 %v50_v30, %v25_v32  ;;  %v80_v52 = vmul.f32 %v60_v29, %v32_v33  ;;  %v81_v53 = vmul.f32 %v60_v29, %v33_v36 }
  0x88   :  { %v82_v54 = vmul.f32 %v60_v29, %v34_v37  ;;  %v83_v55 = vmul.f32 %v60_v29, %v35_v38  ;;  %v84_v8 = vmul.f32 %v60_v29, %v36_v51  ;;  %v85_v9 = vmul.f32 %v60_v29, %v37_v60 }
  0x89   :  { %v98_v49 = vpop.permute.xlu1 %97  ;;  %v93_v50 = vpop.permute.xlu0 %92 }
  0x8a   :  { %v116_v56 = vadd.f32 %v98_v49, %v68_v41  ;;  %v117_v57 = vadd.f32 %v98_v49, %v69_v42  ;;  %v118_v58 = vadd.f32 %v98_v49, %v70_v45  ;;  %v119_v59 = vadd.f32 %v98_v49, %v71_v46 }
  0x8b   :  { %v120_v63 = vadd.f32 %v98_v49, %v72_v47  ;;  %v121_v0 = vadd.f32 %v98_v49, %v73_v48  ;;  %v110_v1 = vadd.f32 %v93_v50, %v62_v25  ;;  %v111_v2 = vadd.f32 %v93_v50, %v63_v26 }
  0x8c   :  { %140 = vst [vmem:[%s365_s3 + $0x30] sm:$0xff] %v116_v56  ;;  %141 = vst [vmem:[%s365_s3 + $0x38] sm:$0xff] %v117_v57  ;;  %v112_v3 = vadd.f32 %v93_v50, %v64_v27  ;;  %v113_v4 = vadd.f32 %v93_v50, %v65_v28  ;;  %v114_v5 = vadd.f32 %v93_v50, %v66_v34 }
  0x8d   :  { %142 = vst [vmem:[%s365_s3 + $0x40] sm:$0xff] %v118_v58  ;;  %143 = vst [vmem:[%s365_s3 + $0x48] sm:$0xff] %v119_v59  ;;  %v115_v6 = vadd.f32 %v93_v50, %v67_v35  ;;  %v108_v7 = vpop.permute.xlu1 %107  ;;  %v103_v10 = vpop.permute.xlu0 %102 }
  0x8e   :  { %144 = vst [vmem:[%s365_s3 + $0x50] sm:$0xff] %v120_v63  ;;  %145 = vst [vmem:[%s365_s3 + $0x58] sm:$0xff] %v121_v0  ;;  %v128_v14 = vadd.f32 %v108_v7, %v80_v52  ;;  %v129_v15 = vadd.f32 %v108_v7, %v81_v53  ;;  %v130_v16 = vadd.f32 %v108_v7, %v82_v54 }
  0x8f   :  { %134 = vst [vmem:[%s365_s3] sm:$0xff] %v110_v1  ;;  %135 = vst [vmem:[%s365_s3 + $0x8] sm:$0xff] %v111_v2  ;;  %v131_v11 = vadd.f32 %v108_v7, %v83_v55  ;;  %v132_v17 = vadd.f32 %v108_v7, %v84_v8  ;;  %v133_v18 = vadd.f32 %v108_v7, %v85_v9 }
  0x90   :  { %136 = vst [vmem:[%s365_s3 + $0x10] sm:$0xff] %v112_v3  ;;  %137 = vst [vmem:[%s365_s3 + $0x18] sm:$0xff] %v113_v4  ;;  %v122_v19 = vadd.f32 %v103_v10, %v74_v39  ;;  %v123_v20 = vadd.f32 %v103_v10, %v75_v40  ;;  %v124_v21 = vadd.f32 %v103_v10, %v76_v43 }
  0x91   :  { %138 = vst [vmem:[%s365_s3 + $0x20] sm:$0xff] %v114_v5  ;;  %139 = vst [vmem:[%s365_s3 + $0x28] sm:$0xff] %v115_v6  ;;  %v125_v22 = vadd.f32 %v103_v10, %v77_v44  ;;  %v126_v23 = vadd.f32 %v103_v10, %v78_v12  ;;  %v127_v24 = vadd.f32 %v103_v10, %v79_v13 }
  0x92   :  { %152 = vst [vmem:[%s365_s3 + $0x90] sm:$0xff] %v128_v14  ;;  %153 = vst [vmem:[%s365_s3 + $0x98] sm:$0xff] %v129_v15 }
  0x93   :  { %154 = vst [vmem:[%s365_s3 + $0xa0] sm:$0xff] %v130_v16  ;;  %155 = vst [vmem:[%s365_s3 + $0xa8] sm:$0xff] %v131_v11 }
  0x94   :  { %156 = vst [vmem:[%s365_s3 + $0xb0] sm:$0xff] %v132_v17  ;;  %157 = vst [vmem:[%s365_s3 + $0xb8] sm:$0xff] %v133_v18 }
  0x95   :  { %146 = vst [vmem:[%s365_s3 + $0x60] sm:$0xff] %v122_v19  ;;  %147 = vst [vmem:[%s365_s3 + $0x68] sm:$0xff] %v123_v20 }
  0x96   :  { %148 = vst [vmem:[%s365_s3 + $0x70] sm:$0xff] %v124_v21  ;;  %149 = vst [vmem:[%s365_s3 + $0x78] sm:$0xff] %v125_v22 }
  0x97   :  { %150 = vst [vmem:[%s365_s3 + $0x80] sm:$0xff] %v126_v23  ;;  %151 = vst [vmem:[%s365_s3 + $0x88] sm:$0xff] %v127_v24 }

// kernel: decoder_block.2
= control target key start
LH: loop header
LB: loop body
LE: loop exit
PB: predicated region body
PF: predicated region fallthrough
CT: control target
= control target key end

     0   :  { %s931_s21 = smov 0   ;;  %s933_s22 = smov 0   ;;  %s1064_s0 = inlined_call_operand.vmem [shape: f32[8,1024], index: 0, kind: input, shape index: {}, may-alias: {0,1}]   ;;  %s1065_s1 = inlined_call_operand.vmem [shape: f32[8,1024], index: 1, kind: input, shape index: {}, may-alias: {0,1}]   ;;  %s1066_s2 = inlined_call_operand.vmem [shape: f32[32,72], index: 2, kind: input, shape index: {}]   ;;  %s1067_s3 = inlined_call_operand.vmem [shape: f32[32,1], index: 3, kind: input, shape index: {}]   ;;  %s1068_s4 = inlined_call_operand.vmem [shape: f32[1,768], index: 4, kind: input, shape index: {}]   ;;  %s1069_s5 = inlined_call_operand.vmem [shape: f32[32,768], index: 5, kind: output, shape index: {0}]   ;;  %s1070_s6 = inlined_call_operand.vmem [shape: f32[3,8,2], index: 6, kind: output, shape index: {1}]  }
   0x1   :  { %s935_s23 = smov 0  }
   0x2 LB: > { %s944_s24 = sadd.s32 4294967295, %s884_s23   ;;  %s946_s25 = sadd.s32 1, %s884_s23   ;;  %s884_s23 = sphi %s935_s23, %s1074_s23   ;;  %s880_s22 = sphi %s933_s22, %s1073_s22   ;;  %s876_s21 = sphi %s931_s21, %s1072_s21  }
   0x3   : > { %s143_s26 = ssub.s32 %s884_s23, %s946_s25  ;;  %s146_s27 = sadd.s32 1, %s880_s22 }
   0x4   : > { %p144_p0 = scmp.eq.s32.totalorder %s143_s26, 0  ;;  %p156_p1 = scmp.ne.s32.totalorder %s880_s22, %s876_s21 }
   0x5   : > { %p157_p2 = scmp.eq.s32.totalorder %s944_s24, 2  ;;  %p745_p3 = scmp.ge.s32.totalorder %s884_s23, 1 }
   0x6   : > { %s954_s28 = scalar_select %p144_p0, %s880_s22, %s146_s27  }
   0x7   : > { %p956_p4 = por %p157_p2, %p156_p1  ;;  %p241_p5 = scmp.lt.s32.totalorder %s884_s23, 4 }
   0x9   : > { %p242_p6 = pnand %p745_p3, %p241_p5 }
   0xa   : > { %s961_s30 = sshll.u32 (!%p242_p6), %s944_s24, 1  ;;  %s886_s13 = smov (!%p242_p6), 110   ;;  %v892_v4 = vmov (!%p242_p6), 0.0   ;;  %v894_v5 = vmov (!%p242_p6), 0   ;;  %v406_v6 = vld [vmem:[%s1067_s3] sm:$0xff] (!%p242_p6)  ;;  %v407_v7 = vld [vmem:[%s1067_s3 + $0x8] sm:$0xff] (!%p242_p6) }
   0xb   : > { %245 = sbr.rel (%p242_p6) target bundleno = 550 (0x226), region = 40  ;;  %p285_p7 = scmp.lt.s32.totalorder (!%p242_p6), %s961_s30, 7  ;;  %507 = vmatprep.mubr.f32.mxu0 (!%p242_p6), %v892_v4  ;;  %519 = vmatprep.mubr.f32.mxu1 (!%p242_p6), %v892_v4  ;;  %v408_v8 = vld [vmem:[%s1067_s3 + $0x10] sm:$0xff] (!%p242_p6)  ;;  %v409_v9 = vld [vmem:[%s1067_s3 + $0x18] sm:$0xff] (!%p242_p6)  ;;  %vm320_vm0 = vcmask (!%p242_p6), 1039360   ;;  %vm342_vm1 = vcmask (!%p242_p6), 900096  }
   0xc   : > { %s763_s7 = sadd.s32 (!%p242_p6), 2, %s961_s30  ;;  %s887_s14 = smov (!%p242_p6), 127   ;;  %861 = vset.pattern.permute.xlu0 (!%p242_p6), %v894_v5  ;;  %860 = vset.pattern.permute.xlu1 (!%p242_p6), %v894_v5  ;;  %vm331_vm2 = vcmask (!%p242_p6), 1031168   ;;  %vm353_vm3 = vcmask (!%p242_p6), 891904   ;;  %vm364_vm4 = vcmask (!%p242_p6), 883712   ;;  %vm375_vm5 = vcmask (!%p242_p6), 752640  }
   0xd   : > { %p292_p8 = scmp.lt.s32.totalorder (!%p242_p6), %s763_s7, 7  ;;  %s888_s19 = smov (!%p242_p6), 126   ;;  %vm386_vm6 = vcmask (!%p242_p6), 744448   ;;  %vm397_vm7 = vcmask (!%p242_p6), 736256   ;;  %vm430_vm8 = vcmask (!%p242_p6), 588800   ;;  %v405_v5 = vld [vmem:[%s1066_s2 + $0x18] sm:$0xff] (!%p242_p6) }
   0xe   : > { %s889_s20 = smov (!%p242_p6), 109   ;;  %s890_s23 = smov (!%p242_p6), 108   ;;  %vm594_vm9 = vcmask (!%p242_p6), 7168   ;;  %vm596_vm10 = vcmask (!%p242_p6), 15360  }
   0xf   : > { %s891_s26 = smov (!%p242_p6), 92   ;;  %s893_s27 = smov (!%p242_p6), 91  }
  0x10   : > { %p299_p9 = scmp.lt.s32.totalorder (!%p242_p6), %s961_s30, 5  ;;  %s275_s10 = sand.u32 (!%p242_p6), 1, %s876_s21  }
  0x11   : > { %s746_s11 = sshll.u32 (!%p242_p6), %s275_s10, 6  ;;  %p304_p10 = scmp.lt.s32.totalorder (!%p242_p6), %s944_s24, 2 }
  0x12   : > { %s286_s8 = scalar_select %p285_p7, %s961_s30, 7 }
  0x13   : > { %s1076_s7 = smov (!%p292_p8, %s763_s7), 7  ;;  %s1078_s30 = smov (!%p299_p9, %s961_s30), 5 }
  0x14   : > { %s748_s9 = sshll.u32 %s286_s8, 3  ;;  %s750_s15 = sshll.u32 %s1076_s7, 3 }
  0x15   : > { %s288_s12 = scalar_lea.vmem %s1064_s0, %s748_s9  ;;  %s295_s18 = scalar_lea.vmem %s1065_s1, %s750_s15 }
  0x16   : > { %v969_v0 = vld [vmem:[%s288_s12] sm:$0xff]  ;;  %v309_v1 = vld [vmem:[%s288_s12 + $0x8] sm:$0xff]  ;;  %s895_s7 = smov 90   ;;  %s301_s9 = scalar_lea.vmem %s1068_s4, %s1078_s30 }
  0x17   : > { %336 = vrot.lane.b32.xlu1 %v969_v0, %s886_s13  ;;  %314 = vrot.lane.b32.xlu0 %v969_v0, %s887_s14  ;;  %v310_v2 = vld [vmem:[%s295_s18] sm:$0xff]  ;;  %s1025_s21 = scalar_lea.vmem [#allocation2], %s746_s11  ;;  %s764_s16 = sshll.u32 (%p956_p4), %s944_s24, 4 }
  0x18   : > { %v830_v3 = vpack.i.bf16 %v310_v2, %v309_v1  ;;  %s305_s30 = scalar_select %p304_p10, %s944_s24, 2 }
  0x1a   : > { %s752_s12 = sshll.u32 %s305_s30, 3 }
  0x1b   : > { %325 = vrot.lane.b32.xlu0 %v969_v0, %s888_s19  ;;  %831 = vrot.lane.b32.xlu1 %v830_v3, %s888_s19  ;;  %s307_s15 = scalar_lea.vmem %s1070_s6, %s752_s12  ;;  %s611_s19 = scalar_lea.vmem (%p956_p4), %s1069_s5, %s764_s16 }
  0x1f   : > { %826 = vrot.lane.b32.xlu0 %v830_v3, %s887_s14  ;;  %836 = vrot.lane.b32.xlu1 %v830_v3, %s886_s13 }
  0x23   : > { %841 = vrot.lane.b32.xlu0 %v830_v3, %s889_s20  ;;  %846 = vrot.lane.b32.xlu1 %v830_v3, %s890_s23 }
  0x27   : > { %347 = vrot.lane.b32.xlu0 %v969_v0, %s889_s20  ;;  %358 = vrot.lane.b32.xlu1 %v969_v0, %s890_s23 }
  0x2b   : > { %851 = vrot.lane.b32.xlu0 %v830_v3, %s891_s26  ;;  %856 = vrot.lane.b32.xlu1 %v830_v3, %s893_s27  ;;  %v403_v3 = vld [vmem:[%s1066_s2 + $0x8] sm:$0xff] }
  0x2f   : > { %369 = vrot.lane.b32.xlu0 %v969_v0, %s891_s26  ;;  %380 = vrot.lane.b32.xlu1 %v969_v0, %s893_s27 }
  0x33   : > { %393 = vrot.lane.b32.xlu0 %v309_v1, %s895_s7  ;;  %395 = vrot.lane.b32.xlu1 %v310_v2, %s895_s7 }
  0x37   : > { %391 = vrot.lane.b32.xlu0 %v969_v0, %s895_s7  ;;  %412 = vperm.xlu1 %860, %v406_v6   ;;  %v550_v6 = vlaneseq }
  0x3b   : > { %417 = vperm.xlu0 %861, %v407_v7   ;;  %422 = vperm.xlu1 %860, %v408_v8   ;;  %v551_v8 = vshrl.u32 %v550_v6, 7 }
  0x3f   : > { %427 = vperm.xlu1 %860, %v409_v9   ;;  %v552_v9 = vsub.s32 0, %v551_v8 }
  0x89   : > { %v337_v10 = vpop.permute.xlu1 %336  ;;  %v315_v11 = vpop.permute.xlu0 %314 }
  0x8d   : > { %v326_v12 = vpop.permute.xlu0 %325  ;;  %v832_v13 = vpop.permute.xlu1 %831 }
  0x8e   : > { %v834_v15 = vunpack.i.h.bf16 %v832_v13  ;;  %v833_v18 = vunpack.i.l.bf16 %v832_v13 }
  0x90   : > { %v333_v29 = vsel %vm331_vm2, %v833_v18, %v834_v15  ;;  %v332_v37 = vsel %vm331_vm2, %v326_v12, %v833_v18 }
  0x91   : > { %v827_v14 = vpop.permute.xlu0 %826  ;;  %v837_v19 = vpop.permute.xlu1 %836 }
  0x92   : > { %v829_v16 = vunpack.i.h.bf16 %v827_v14  ;;  %v828_v17 = vunpack.i.l.bf16 %v827_v14  ;;  %v839_v20 = vunpack.i.h.bf16 %v837_v19  ;;  %v838_v21 = vunpack.i.l.bf16 %v837_v19 }
  0x94   : > { %v322_v22 = vsel %vm320_vm0, %v828_v17, %v829_v16  ;;  %v321_v23 = vsel %vm320_vm0, %v315_v11, %v828_v17  ;;  %v344_v30 = vsel %vm342_vm1, %v838_v21, %v839_v20  ;;  %v343_v33 = vsel %vm342_vm1, %v337_v10, %v838_v21  ;;  %v548_v10 = vld [vmem:[%s301_s9] sm:$0x3] }
  0x95   : > { %v842_v24 = vpop.permute.xlu0 %841  ;;  %v765_v25 = vpack.c.bf16 %v322_v22, %v309_v1  ;;  %v767_v26 = vpack.c.bf16 %v321_v23, %v969_v0  ;;  %v847_v31 = vpop.permute.xlu1 %846  ;;  %v769_v32 = vpack.c.bf16 %v344_v30, %v333_v29  ;;  %v771_v39 = vpack.c.bf16 %v343_v33, %v332_v37  ;;  %v402_v0 = vld [vmem:[%s1066_s2] sm:$0xff]  ;;  %v404_v1 = vld [vmem:[%s1066_s2 + $0x10] sm:$0xff] }
  0x96   : > { %v844_v27 = vunpack.i.h.bf16 %v842_v24  ;;  %v843_v28 = vunpack.i.l.bf16 %v842_v24  ;;  %v849_v34 = vunpack.i.h.bf16 %v847_v31  ;;  %v848_v35 = vunpack.i.l.bf16 %v847_v31 }
  0x97   : > { %766 = vmatprep.subr.bf16.mxu0 %v765_v25  ;;  %781 = vmatprep.subr.bf16.mxu1 %v765_v25  ;;  %v556_v11 = vsub.s32 1, %v551_v8  ;;  %v553_v15 = vrot.slane %v548_v10, %v552_v9 }
  0x98   : > { %768 = vmatpush1.bf16.msra.mxu0 %v767_v26  ;;  %786 = vmatpush1.bf16.msra.mxu1 %v767_v26  ;;  %v355_v36 = vsel %vm353_vm3, %v843_v28, %v844_v27  ;;  %v366_v40 = vsel %vm364_vm4, %v848_v35, %v849_v34 }
  0x99   : > { %v348_v38 = vpop.permute.xlu0 %347  ;;  %770 = vmatprep.subr.bf16.mxu0 %v769_v32  ;;  %782 = vmatprep.subr.bf16.mxu1 %v769_v32  ;;  %v359_v41 = vpop.permute.xlu1 %358  ;;  %v773_v43 = vpack.c.bf16 %v366_v40, %v355_v36  ;;  %v557_v20 = vrot.slane %v548_v10, %v556_v11 }
  0x9a   : > { %v354_v42 = vsel %vm353_vm3, %v348_v38, %v843_v28  ;;  %v365_v44 = vsel %vm364_vm4, %v359_v41, %v848_v35 }
  0x9b   : > { %v775_v46 = vpack.c.bf16 %v365_v44, %v354_v42 }
  0x9c   : > { %772 = vmatpush1.bf16.msra.mxu0 %v771_v39  ;;  %787 = vmatpush1.bf16.msra.mxu1 %v771_v39 }
  0x9d   : > { %v852_v45 = vpop.permute.xlu0 %851  ;;  %774 = vmatprep.subr.bf16.mxu0 %v773_v43  ;;  %783 = vmatprep.subr.bf16.mxu1 %v773_v43  ;;  %v857_v49 = vpop.permute.xlu1 %856 }
  0x9e   : > { %v854_v47 = vunpack.i.h.bf16 %v852_v45  ;;  %v853_v48 = vunpack.i.l.bf16 %v852_v45  ;;  %v859_v50 = vunpack.i.h.bf16 %v857_v49  ;;  %v858_v51 = vunpack.i.l.bf16 %v857_v49 }
  0xa0   : > { %776 = vmatpush1.bf16.msra.mxu0 %v775_v46  ;;  %788 = vmatpush1.bf16.msra.mxu1 %v775_v46  ;;  %v377_v52 = vsel %vm375_vm5, %v853_v48, %v854_v47  ;;  %v388_v55 = vsel %vm386_vm6, %v858_v51, %v859_v50 }
  0xa1   : > { %v370_v53 = vpop.permute.xlu0 %369  ;;  %v381_v56 = vpop.permute.xlu1 %380  ;;  %v777_v57 = vpack.c.bf16 %v388_v55, %v377_v52 }
  0xa2   : > { %v376_v54 = vsel %vm375_vm5, %v370_v53, %v853_v48  ;;  %v387_v58 = vsel %vm386_vm6, %v381_v56, %v858_v51 }
  0xa3   : > { %v779_v59 = vpack.c.bf16 %v387_v58, %v376_v54  ;;  %778 = vmatprep.subr.bf16.mxu0 %v777_v57  ;;  %784 = vmatprep.subr.bf16.mxu1 %v777_v57 }
  0xa5   : > { %v394_v60 = vpop.permute.xlu0 %393  ;;  %v396_v61 = vpop.permute.xlu1 %395  ;;  %780 = vmatpush1.bf16.msra.mxu0 %v779_v59  ;;  %789 = vmatpush1.bf16.msra.mxu1 %v779_v59 }
  0xa6   : > { %v399_v62 = vsel %vm397_vm7, %v394_v60, %v396_v61 }
  0xa7   : > { %459 = vmatprep.subr.mxu0 %v399_v62  ;;  %785 = vmatprep.subr.mxu1 %v399_v62 }
  0xa9   : > { %v392_v63 = vpop.permute.xlu0 %391 }
  0xaa   : > { %v398_v2 = vsel %vm397_vm7, %v392_v63, %v394_v60 }
  0xab   : > { %460 = vmatpush1.msra.mxu0 %v398_v2  ;;  %790 = vmatpush1.msra.mxu1 %v398_v2 }
  0xac   : > { %753 = vmatmul.mubr.msk.f32.vlgmr.msra.gmra.mrb[0].mxu0 %vm430_vm8, %v402_v0  ;;  %755 = vmatmul.mubr.msk.f32.vlgmr.msra.gmra.mrb[0].mxu1 %vm430_vm8, %v404_v1 }
  0xad   : > { %513 = vmatprep.mubr.f32.mxu0 %v892_v4  ;;  %525 = vmatprep.mubr.f32.mxu1 %v892_v4 }
  0xb0   : > { %754 = vmatmul.mubr.msk.f32.gmra.mrb[2].mxu0 %vm430_vm8, %v403_v3  ;;  %756 = vmatmul.mubr.msk.f32.gmra.mrb[2].mxu1 %vm430_vm8, %v405_v5 }
  0xb6   : > { %v413_v7 = vpop.permute.xlu1 %412 }
  0xba   : > { %v423_v4 = vpop.permute.xlu1 %422  ;;  %v418_v22 = vpop.permute.xlu0 %417 }
  0xbe   : > { %v428_v25 = vpop.permute.xlu1 %427 }
 0x17f   : > { %v509_v12 = vpop.f32.mrb[0].mxu0  ;;  %v521_v13 = vpop.f32.mrb[0].mxu1 }
 0x180   : > { %v510_v14 = vadd.f32 %v509_v12, %v413_v7  ;;  %v522_v16 = vadd.f32 %v521_v13, %v423_v4  ;;  %v511_v17 = vpop.f32.mrb[1].mxu0  ;;  %v523_v18 = vpop.f32.mrb[1].mxu1 }
 0x181   : > { %v512_v19 = vadd.f32 %v511_v17, %v413_v7  ;;  %v524_v21 = vadd.f32 %v523_v18, %v423_v4 }
 0x182   : > { %v532_v23 = vmax.f32 %v510_v14, 0.0  ;;  %v536_v24 = vmax.f32 %v522_v16, 0.0 }
 0x183   : > { %v533_v26 = vmax.f32 %v512_v19, 0.0  ;;  %v537_v27 = vmax.f32 %v524_v21, 0.0  ;;  %v515_v28 = vpop.f32.mrb[2].mxu0  ;;  %v527_v29 = vpop.f32.mrb[2].mxu1 }
 0x184   : > { %540 = vst [vmem:[%s1025_s21] sm:$0xff] %v532_v23  ;;  %v560_v30 = vmul.f32 %v553_v15, %v532_v23  ;;  %544 = vst [vmem:[%s1025_s21 + $0x20] sm:$0xff] %v536_v24  ;;  %v564_v31 = vmul.f32 %v553_v15, %v536_v24  ;;  %v516_v32 = vadd.f32 %v515_v28, %v418_v22  ;;  %v517_v34 = vpop.f32.mrb[3].mxu0  ;;  %v529_v35 = vpop.f32.mrb[3].mxu1 }
 0x185   : > { %v528_v33 = vadd.f32 %v527_v29, %v428_v25  ;;  %541 = vst [vmem:[%s1025_s21 + $0x8] sm:$0xff] %v533_v26  ;;  %v561_v36 = vmul.f32 %v557_v20, %v533_v26  ;;  %545 = vst [vmem:[%s1025_s21 + $0x28] sm:$0xff] %v537_v27  ;;  %v565_v37 = vmul.f32 %v557_v20, %v537_v27 }
 0x186   : > { %v518_v38 = vadd.f32 %v517_v34, %v418_v22  ;;  %v530_v39 = vadd.f32 %v529_v35, %v428_v25  ;;  %v577_v40 = vmul.f32 %v560_v30, %v532_v23  ;;  %v581_v41 = vmul.f32 %v564_v31, %v536_v24 }
 0x187   : > { %v534_v42 = vmax.f32 %v516_v32, 0.0  ;;  %v538_v43 = vmax.f32 %v528_v33, 0.0  ;;  %v578_v44 = vmul.f32 %v561_v36, %v533_v26  ;;  %v582_v45 = vmul.f32 %v565_v37, %v537_v27 }
 0x188   : > { %v535_v46 = vmax.f32 %v518_v38, 0.0  ;;  %v539_v47 = vmax.f32 %v530_v39, 0.0 }
 0x189   : > { %542 = vst [vmem:[%s1025_s21 + $0x10] sm:$0xff] %v534_v42  ;;  %v562_v48 = vmul.f32 %v553_v15, %v534_v42  ;;  %546 = vst [vmem:[%s1025_s21 + $0x30] sm:$0xff] %v538_v43  ;;  %v566_v49 = vmul.f32 %v553_v15, %v538_v43 }
 0x18a   : > { %543 = vst [vmem:[%s1025_s21 + $0x18] sm:$0xff] %v535_v46  ;;  %v563_v50 = vmul.f32 %v557_v20, %v535_v46  ;;  %547 = vst [vmem:[%s1025_s21 + $0x38] sm:$0xff] %v539_v47  ;;  %v567_v51 = vmul.f32 %v557_v20, %v539_v47 }
 0x18b   : > { %v579_v52 = vmul.f32 %v562_v48, %v534_v42  ;;  %v568_v53 = vadd.f32 %v562_v48, %v560_v30  ;;  %v583_v54 = vmul.f32 %v566_v49, %v538_v43  ;;  %v624_v9 = vld [vmem:[%s1025_s21] sm:$0xff] (%p956_p4) }
 0x18c   : > { %v580_v55 = vmul.f32 %v563_v50, %v535_v46  ;;  %v571_v56 = vadd.f32 %v563_v50, %v561_v36  ;;  %v584_v57 = vmul.f32 %v567_v51, %v539_v47  ;;  %v626_v10 = vld [vmem:[%s1025_s21 + $0x8] sm:$0xff] (%p956_p4)  ;;  %v632_v13 = vld [vmem:[%s1025_s21 + $0x20] sm:$0xff] (%p956_p4)  ;;  %625 = vst [vmem:[%s611_s19] sm:$0xff] (%p956_p4), %v624_v9 }
 0x18d   : > { %v569_v58 = vadd.f32 %v568_v53, %v564_v31  ;;  %v585_v59 = vadd.f32 %v579_v52, %v577_v40  ;;  %v634_v14 = vld [vmem:[%s1025_s21 + $0x28] sm:$0xff] (%p956_p4)  ;;  %627 = vst [vmem:[%s611_s19 + $0x8] sm:$0xff] (%p956_p4), %v626_v10  ;;  %633 = vst [vmem:[%s611_s19 + $0x60] sm:$0xff] (%p956_p4), %v632_v13 }
 0x18e   : > { %v572_v60 = vadd.f32 %v571_v56, %v565_v37  ;;  %v588_v61 = vadd.f32 %v580_v55, %v578_v44  ;;  %635 = vst [vmem:[%s611_s19 + $0x68] sm:$0xff] (%p956_p4), %v634_v14 }
 0x18f   : > { %v570_v62 = vadd.f32 %v569_v58, %v566_v49  ;;  %v586_v63 = vadd.f32 %v585_v59, %v581_v41 }
 0x190   : > { %v573_v0 = vadd.f32 %v572_v60, %v567_v51  ;;  %v589_v1 = vadd.f32 %v588_v61, %v582_v45  ;;  %v628_v11 = vld [vmem:[%s1025_s21 + $0x10] sm:$0xff] (%p956_p4) }
 0x191   : > { %v587_v2 = vadd.f32 %v586_v63, %v583_v54  ;;  %v630_v12 = vld [vmem:[%s1025_s21 + $0x18] sm:$0xff] (%p956_p4)  ;;  %629 = vst [vmem:[%s611_s19 + $0x30] sm:$0xff] (%p956_p4), %v628_v11  ;;  %v636_v15 = vld [vmem:[%s1025_s21 + $0x30] sm:$0xff] (%p956_p4) }
 0x192   : > { %v574_v3 = vadd.f32 %v573_v0, %v570_v62  ;;  %v590_v5 = vadd.f32 %v589_v1, %v584_v57  ;;  %631 = vst [vmem:[%s611_s19 + $0x38] sm:$0xff] (%p956_p4), %v630_v12  ;;  %v638_v16 = vld [vmem:[%s1025_s21 + $0x38] sm:$0xff] (%p956_p4)  ;;  %637 = vst [vmem:[%s611_s19 + $0x90] sm:$0xff] (%p956_p4), %v636_v15 }
 0x193   : > { %639 = vst [vmem:[%s611_s19 + $0x98] sm:$0xff] (%p956_p4), %v638_v16 }
 0x194   : > { %575 = vadd.xlane.f32.xlu0 %v574_v3  ;;  %v591_v6 = vadd.f32 %v590_v5, %v587_v2 }
 0x196   : > { %592 = vadd.xlane.f32.xlu1 %v591_v6 }
 0x21f   : > { %608 = sbr.rel (!%p956_p4) target bundleno = 550 (0x226), region = 44 }
 0x221   : > { %v576_v7 = vpop.xlane.xlu0 %575 }
 0x223   : > { %v593_v8 = vpop.xlane.xlu1 %592 }
 0x224   : > { %v595_v4 = vsel %vm594_vm9, %v576_v7, %v593_v8 }
 0x225   : > { %597 = vst.msk [vmem:[%s307_s15] sm:$0xff] %vm596_vm10, %v595_v4 }
 0x226 PF: > { %p14_p11 = scmp.ge.s32.totalorder %s946_s25, 5   ;;  %s1072_s21 = smov %s880_s22 }
 0x227   : > { %s1073_s22 = smov %s954_s28  ;;  %s1074_s23 = smov %s946_s25 }
 0x228   :  { %16 = sbr.rel (!%p14_p11) target bundleno = 2 (0x2), region = 111 }

</bundles_post_ra>
